<compile_context>
chip_gen: v7x
topology: tpu7x:2x2x1
jax: 0.10.0
libtpu: 0.0.40
codegen_flags: <defaults>
</compile_context>

<pallas_src>
import numpy as np
import jax
import jax.numpy as jnp
from jax import lax
from jax.experimental import pallas as pl
from jax.experimental.pallas import tpu as pltpu

# ----- module constants (from the PyTorch spec) -----
N_EMBD     = 384          # n_embd
BLOCK_SIZE = 256          # max sequence length (tril buffer size)
HEAD_SIZE  = 64           # head_size passed to Header (n_embd // n_head = 384//6)


# ---------------------------------------------------------------------------
# Pallas kernel: Bb batch elements of Header forward per grid step.
# ---------------------------------------------------------------------------
def header_kernel(x_ref, w_ref, o_ref):
    Bb, T, C = x_ref.shape
    H3 = w_ref.shape[1]
    H = H3 // 3
    scale = C ** (-0.5)                            # reference scales by n_embd**-0.5

    # Cast to bf16 in-kernel (VPU, ~free) instead of a wrapper-side XLA pass.
    x = x_ref[...].astype(jnp.bfloat16).reshape(Bb * T, C)   # major-dim merge, layout-free
    w = w_ref[...].astype(jnp.bfloat16)                      # (C, 3H), resident block

    # Fused QKV projection: one M=(Bb*T), K=C, N=3H matmul on the MXU.
    qkv = jnp.dot(x, w, preferred_element_type=jnp.float32)  # (Bb*T, 3H) f32
    qkv = qkv.reshape(Bb, T, H3)

    q = qkv[:, :, 0 * H:1 * H] * scale             # scale applied to q, not the TxT scores
    k = qkv[:, :, 1 * H:2 * H]
    v = qkv[:, :, 2 * H:3 * H]

    # Scores: batched matmul contracting the head dim directly (no k transpose).
    wei = jnp.einsum('bqd,bkd->bqk',
                     q.astype(jnp.bfloat16), k.astype(jnp.bfloat16),
                     preferred_element_type=jnp.float32)     # (Bb, T, T) f32

    # Causal mask built in-kernel (no (T,T) bias DMA); large finite negative
    # instead of -inf avoids inf-inf = NaN in the softmax shift.
    row = lax.broadcasted_iota(jnp.int32, (T, T), 0)
    col = lax.broadcasted_iota(jnp.int32, (T, T), 1)
    causal = (col <= row)[None, :, :]
    wei = jnp.where(causal, wei, -1e30)

    # Softmax in f32 (VPU/EUP).
    m = jnp.max(wei, axis=-1, keepdims=True)
    e = jnp.exp(wei - m)
    denom = jnp.sum(e, axis=-1, keepdims=True)
    p = e * pl.reciprocal(denom, approx=True)      # EUP reciprocal (free slot)

    # Dropout is identity in eval mode.
    out = jnp.einsum('bqk,bkd->bqd',
                     p.astype(jnp.bfloat16), v.astype(jnp.bfloat16),
                     preferred_element_type=jnp.float32)     # (Bb, T, H)
    o_ref[...] = out.astype(o_ref.dtype)


# ---------------------------------------------------------------------------
# pallas_call wrapper
# ---------------------------------------------------------------------------
@jax.jit
def header_forward(x, wq, wk, wv):
    """x: (B, T, C) f32; wq/wk/wv: (C, H) f32 (pre-transposed nn.Linear weights)."""
    B, T, C = x.shape
    H = wq.shape[1]

    # Fuse the three projection weights into one (C, 3H) operand (q|k|v order).
    w = jnp.concatenate([wq, wk, wv], axis=1)      # (C, 3H) f32

    # Batch block: amortize per-grid-step overhead (v5e/v6e single TC) while
    # keeping >=2 parallel grid steps whenever possible (v7x has 2 TCs).
    if B >= 2 and B % 2 == 0:
        bb = B // 2
    else:
        bb = 1
    grid = (B // bb,)

    flops = 2 * B * T * C * (3 * H) + 4 * B * T * T * H      # QKV proj + scores + PV
    cost = pl.CostEstimate(
        flops=flops,
        transcendentals=B * T * T,                           # exp
        bytes_accessed=B * T * C * 4 + C * 3 * H * 4 + B * T * H * 4,
    )

    return pl.pallas_call(
        header_kernel,
        out_shape=jax.ShapeDtypeStruct((B, T, H), jnp.float32),
        grid=grid,
        in_specs=[
            pl.BlockSpec((bb, T, C), lambda i: (i, 0, 0)),   # x, Bb batch rows per step
            pl.BlockSpec((C, 3 * H), lambda i: (0, 0)),      # fused Wqkv (resident)
        ],
        out_specs=pl.BlockSpec((bb, T, H), lambda i: (i, 0, 0)),
        compiler_params=pltpu.CompilerParams(
            dimension_semantics=("parallel",)),
        cost_estimate=cost,
    )(x, w)


# ---------------------------------------------------------------------------
# Pure-JAX (f32) reference for verification
# ---------------------------------------------------------------------------
def ref_forward(x, wq, wk, wv, tril):
    B, T, C = x.shape
    q = x @ wq
    k = x @ wk
    v = x @ wv
    wei = jnp.einsum('btd,bsd->bts', q, k) * (C ** -0.5)
    wei = jnp.where(tril, wei, -jnp.inf)
    wei = jax.nn.softmax(wei, axis=-1)
    return wei @ v


# ---------------------------------------------------------------------------
if __name__ == "__main__":
    B, T = 2, 128                      # T <= block_size (256)
    C, H = N_EMBD, HEAD_SIZE

    key = jax.random.PRNGKey(0)
    kx, kq, kk, kv = jax.random.split(key, 4)
    x  = jax.random.normal(kx, (B, T, C), jnp.float32)
    wq = jax.random.normal(kq, (C, H), jnp.float32) / np.sqrt(C)
    wk = jax.random.normal(kk, (C, H), jnp.float32) / np.sqrt(C)
    wv = jax.random.normal(kv, (C, H), jnp.float32) / np.sqrt(C)

    out = header_forward(x, wq, wk, wv)
    out = jax.block_until_ready(out)
    assert out.shape == (B, T, H)

    tril = jnp.tril(jnp.ones((T, T), dtype=bool))
    ref = np.asarray(ref_forward(x, wq, wk, wv, tril))
    np.testing.assert_allclose(np.asarray(out), ref, rtol=2e-2, atol=2e-2)

    print("KERNEL_OK")
</pallas_src>

<mosaic_0001>
module attributes {stable_mosaic.version = 11 : i64} {
  func.func @header_kernel(%arg0: i32, %arg1: memref<1x128x384xf32, #tpu.memory_space<vmem>>, %arg2: memref<384x192xf32, #tpu.memory_space<vmem>>, %arg3: memref<1x128x64xf32, #tpu.memory_space<vmem>>) attributes {dimension_semantics = [#tpu.dimension_semantics<parallel>], iteration_bounds = array<i64: 2>, scalar_prefetch = 0 : i64, scratch_operands = 0 : i64, tpu.core_type = #tpu.core_type<tc>, window_params = [{transform_indices = @transform_0, window_bounds = array<i64: 1, 128, 384>}, {pipeline_mode = #tpu.pipeline_mode<synchronous>, transform_indices = @transform_1, window_bounds = array<i64: 384, 192>}, {transform_indices = @transform_2, window_bounds = array<i64: 1, 128, 64>}]} {
    %c0 = arith.constant 0 : index
    %c0_0 = arith.constant 0 : index
    %c0_1 = arith.constant 0 : index
    %0 = vector.load %arg1[%c0, %c0_0, %c0_1] : memref<1x128x384xf32, #tpu.memory_space<vmem>>, vector<1x128x384xf32>
    %1 = arith.truncf %0 : vector<1x128x384xf32> to vector<1x128x384xbf16>
    %2 = vector.shape_cast %1 : vector<1x128x384xbf16> to vector<128x384xbf16>
    %c0_2 = arith.constant 0 : index
    %c0_3 = arith.constant 0 : index
    %3 = vector.load %arg2[%c0_2, %c0_3] : memref<384x192xf32, #tpu.memory_space<vmem>>, vector<384x192xf32>
    %4 = arith.truncf %3 : vector<384x192xf32> to vector<384x192xbf16>
    %cst = arith.constant dense<0.000000e+00> : vector<128x192xf32>
    %5 = tpu.matmul %2, %4, %cst {dimension_numbers = #tpu.dot_dimension_numbers<[1], [0], [0], [1], [0, 0, 1, 1], [], []>} : vector<128x384xbf16>, vector<384x192xbf16>, vector<128x192xf32> -> vector<128x192xf32>
    %6 = vector.shape_cast %5 : vector<128x192xf32> to vector<1x128x192xf32>
    %7 = vector.extract_strided_slice %6 {offsets = [0, 0, 0], sizes = [1, 128, 64], strides = [1, 1, 1]} : vector<1x128x192xf32> to vector<1x128x64xf32>
    %cst_4 = arith.constant 0.0510310382 : f32
    %8 = vector.broadcast %cst_4 : f32 to vector<1x128x64xf32>
    %9 = arith.mulf %7, %8 : vector<1x128x64xf32>
    %10 = vector.extract_strided_slice %6 {offsets = [0, 0, 64], sizes = [1, 128, 64], strides = [1, 1, 1]} : vector<1x128x192xf32> to vector<1x128x64xf32>
    %11 = vector.extract_strided_slice %6 {offsets = [0, 0, 128], sizes = [1, 128, 64], strides = [1, 1, 1]} : vector<1x128x192xf32> to vector<1x128x64xf32>
    %12 = arith.truncf %9 : vector<1x128x64xf32> to vector<1x128x64xbf16>
    %13 = arith.truncf %10 : vector<1x128x64xf32> to vector<1x128x64xbf16>
    "tpu.trace_start"() <{level = 10 : i32, message = "bqd,bkd->bqk"}> : () -> ()
    %cst_5 = arith.constant dense<0.000000e+00> : vector<1x128x128xf32>
    %14 = tpu.matmul %12, %13, %cst_5 {dimension_numbers = #tpu.dot_dimension_numbers<[2], [2], [1], [1], [0, 0, 0, 1, 1, 1], [0], [0]>} : vector<1x128x64xbf16>, vector<1x128x64xbf16>, vector<1x128x128xf32> -> vector<1x128x128xf32>
    "tpu.trace_stop"() : () -> ()
    %15 = tpu.iota {dimensions = array<i32: 0>} : vector<128x128xi32>
    %16 = tpu.iota {dimensions = array<i32: 1>} : vector<128x128xi32>
    %17 = arith.cmpi sle, %16, %15 : vector<128x128xi32>
    %18 = vector.shape_cast %17 : vector<128x128xi1> to vector<1x128x128xi1>
    %cst_6 = arith.constant -1.000000e+30 : f32
    %19 = vector.broadcast %cst_6 : f32 to vector<1x128x128xf32>
    %20 = arith.select %18, %14, %19 : vector<1x128x128xi1>, vector<1x128x128xf32>
    %cst_7 = arith.constant dense<0xFF800000> : vector<1x128xf32>
    %21 = vector.multi_reduction <maximumf>, %20, %cst_7 [2] : vector<1x128x128xf32> to vector<1x128xf32>
    %22 = vector.shape_cast %21 : vector<1x128xf32> to vector<1x128x1xf32>
    %23 = vector.broadcast %22 : vector<1x128x1xf32> to vector<1x128x128xf32>
    %24 = arith.subf %20, %23 : vector<1x128x128xf32>
    %25 = math.exp %24 : vector<1x128x128xf32>
    %cst_8 = arith.constant dense<0.000000e+00> : vector<1x128xf32>
    %26 = vector.multi_reduction <add>, %25, %cst_8 [2] : vector<1x128x128xf32> to vector<1x128xf32>
    %27 = vector.shape_cast %26 : vector<1x128xf32> to vector<1x128x1xf32>
    %28 = tpu.reciprocal %27 {approx = true} : vector<1x128x1xf32> -> vector<1x128x1xf32>
    %29 = vector.broadcast %28 : vector<1x128x1xf32> to vector<1x128x128xf32>
    %30 = arith.mulf %25, %29 : vector<1x128x128xf32>
    %31 = arith.truncf %30 : vector<1x128x128xf32> to vector<1x128x128xbf16>
    %32 = arith.truncf %11 : vector<1x128x64xf32> to vector<1x128x64xbf16>
    "tpu.trace_start"() <{level = 10 : i32, message = "bqk,bkd->bqd"}> : () -> ()
    %cst_9 = arith.constant dense<0.000000e+00> : vector<1x128x64xf32>
    %33 = tpu.matmul %31, %32, %cst_9 {dimension_numbers = #tpu.dot_dimension_numbers<[2], [1], [1], [2], [0, 0, 0, 1, 1, 2], [0], [0]>} : vector<1x128x128xbf16>, vector<1x128x64xbf16>, vector<1x128x64xf32> -> vector<1x128x64xf32>
    "tpu.trace_stop"() : () -> ()
    %c0_10 = arith.constant 0 : index
    %c0_11 = arith.constant 0 : index
    %c0_12 = arith.constant 0 : index
    %34 = vector.load %arg3[%c0_10, %c0_11, %c0_12] : memref<1x128x64xf32, #tpu.memory_space<vmem>>, vector<1x128x64xf32>
    tpu.vector_store %arg3[%c0_10, %c0_11, %c0_12], %33 {strides = array<i32>} : memref<1x128x64xf32, #tpu.memory_space<vmem>>, vector<1x128x64xf32>,
    return
  }
  func.func @transform_0(%arg0: i32) -> (i32, i32, i32) {
    %c0_i32 = arith.constant 0 : i32
    %c0_i32_0 = arith.constant 0 : i32
    %c0_i32_1 = arith.constant 0 : i32
    return %arg0, %c0_i32, %c0_i32_0 : i32, i32, i32
  }
  func.func @transform_1(%arg0: i32) -> (i32, i32) {
    %c0_i32 = arith.constant 0 : i32
    %c0_i32_0 = arith.constant 0 : i32
    %c0_i32_1 = arith.constant 0 : i32
    return %c0_i32, %c0_i32_0 : i32, i32
  }
  func.func @transform_2(%arg0: i32) -> (i32, i32, i32) {
    %c0_i32 = arith.constant 0 : i32
    %c0_i32_0 = arith.constant 0 : i32
    %c0_i32_1 = arith.constant 0 : i32
    return %arg0, %c0_i32, %c0_i32_0 : i32, i32, i32
  }
}

</mosaic_0001>

<bundles_post_ra>
// kernel: header_forward.1
= control target key start
LH: loop header
LB: loop body
LE: loop exit
PB: predicated region body
PF: predicated region fallthrough
CT: control target
= control target key end

     0   :  { %s1439_s9 = smov 0   ;;  %s2142_s0 = inlined_call_operand.vmem [shape: f32[2,128,384], index: 0, kind: input, shape index: {}]   ;;  %s2143_s1 = inlined_call_operand.vmem [shape: f32[384,192], index: 1, kind: input, shape index: {}]   ;;  %s2144_s2 = inlined_call_operand.vmem [shape: f32[2,128,64], index: 2, kind: output, shape index: {}]  }
   0x1 LB: > { %s1168_s10 = sadd.s32 4294967295, %s1420_s9   ;;  %p1172_p0 = scmp.ge.s32.totalorder %s1420_s9, 1  ;;  %s1420_s9 = sphi %s1439_s9, %s12_s9  }
   0x2   : > { %p112_p1 = scmp.lt.s32.totalorder %s1420_s9, 3 }
   0x4   : > { %p113_p2 = pnand %p1172_p0, %p112_p1 }
   0x5   : > { %v218_v0 = vld [vmem:[%s2143_s1 + $0x8] sm:$0xff] (!%p113_p2)  ;;  %v220_v1 = vld [vmem:[%s2143_s1 + $0x18] sm:$0xff] (!%p113_p2)  ;;  %v217_v2 = vld [vmem:[%s2143_s1] sm:$0xff] (!%p113_p2)  ;;  %v1422_v7 = vmov (!%p113_p2), 0   ;;  %p1570_p3 = scmp.lt.s32.totalorder (!%p113_p2), %s1168_s10, 1  ;;  %vm643_vm0 = vcmask (!%p113_p2), 523264  }
   0x6   : > { %116 = sbr.rel (%p113_p2) target bundleno = 1249 (0x4e1), region = 28  ;;  %v314_v3 = vpack.c.bf16 (!%p113_p2), %v220_v1, %v218_v0  ;;  %v219_v4 = vld [vmem:[%s2143_s1 + $0x10] sm:$0xff] (!%p113_p2)  ;;  %v222_v5 = vld [vmem:[%s2143_s1 + $0x28] sm:$0xff] (!%p113_p2)  ;;  %v224_v6 = vld [vmem:[%s2143_s1 + $0x38] sm:$0xff] (!%p113_p2)  ;;  %506 = vmatprep.mubr.bf16.mxu1 (!%p113_p2), %v1422_v7 }
   0x7   : > { %v313_v8 = vpack.c.bf16 (!%p113_p2), %v219_v4, %v217_v2  ;;  %v316_v9 = vpack.c.bf16 (!%p113_p2), %v224_v6, %v222_v5  ;;  %v221_v10 = vld [vmem:[%s2143_s1 + $0x20] sm:$0xff] (!%p113_p2)  ;;  %v223_v11 = vld [vmem:[%s2143_s1 + $0x30] sm:$0xff] (!%p113_p2)  ;;  %v226_v12 = vld [vmem:[%s2143_s1 + $0x48] sm:$0xff] (!%p113_p2) }
   0x8   : > { %361 = vmatprep.subr.bf16.mxu0 (!%p113_p2), %v314_v3  ;;  %v228_v13 = vld [vmem:[%s2143_s1 + $0x58] sm:$0xff] (!%p113_p2)  ;;  %v315_v14 = vpack.c.bf16 (!%p113_p2), %v223_v11, %v221_v10  ;;  %v225_v16 = vld [vmem:[%s2143_s1 + $0x40] sm:$0xff] (!%p113_p2)  ;;  %v227_v17 = vld [vmem:[%s2143_s1 + $0x50] sm:$0xff] (!%p113_p2) }
   0x9   : > { %362 = vmatpush1.bf16.msra.mxu0 (!%p113_p2), %v313_v8  ;;  %v318_v15 = vpack.c.bf16 (!%p113_p2), %v228_v13, %v226_v12  ;;  %v230_v18 = vld [vmem:[%s2143_s1 + $0x68] sm:$0xff] (!%p113_p2)  ;;  %v232_v19 = vld [vmem:[%s2143_s1 + $0x78] sm:$0xff] (!%p113_p2)  ;;  %v317_v20 = vpack.c.bf16 (!%p113_p2), %v227_v17, %v225_v16  ;;  %v229_v22 = vld [vmem:[%s2143_s1 + $0x60] sm:$0xff] (!%p113_p2) }
   0xa   : > { %363 = vmatprep.subr.bf16.mxu0 (!%p113_p2), %v316_v9  ;;  %v320_v21 = vpack.c.bf16 (!%p113_p2), %v232_v19, %v230_v18  ;;  %v231_v23 = vld [vmem:[%s2143_s1 + $0x70] sm:$0xff] (!%p113_p2)  ;;  %v234_v24 = vld [vmem:[%s2143_s1 + $0x88] sm:$0xff] (!%p113_p2)  ;;  %v236_v25 = vld [vmem:[%s2143_s1 + $0x98] sm:$0xff] (!%p113_p2) }
   0xb   : > { %v282_v26 = vld [vmem:[%s2143_s1 + $0x208] sm:$0xff] (!%p113_p2)  ;;  %v284_v27 = vld [vmem:[%s2143_s1 + $0x218] sm:$0xff] (!%p113_p2)  ;;  %v281_v28 = vld [vmem:[%s2143_s1 + $0x200] sm:$0xff] (!%p113_p2)  ;;  %v319_v30 = vpack.c.bf16 (!%p113_p2), %v231_v23, %v229_v22  ;;  %v322_v35 = vpack.c.bf16 (!%p113_p2), %v236_v25, %v234_v24 }
   0xc   : > { %v283_v29 = vld [vmem:[%s2143_s1 + $0x210] sm:$0xff] (!%p113_p2)  ;;  %v233_v31 = vld [vmem:[%s2143_s1 + $0x80] sm:$0xff] (!%p113_p2)  ;;  %v346_v33 = vpack.c.bf16 (!%p113_p2), %v284_v27, %v282_v26  ;;  %v238_v36 = vld [vmem:[%s2143_s1 + $0xa8] sm:$0xff] (!%p113_p2) }
   0xd   : > { %364 = vmatpush1.bf16.msra.mxu0 %v315_v14  ;;  %v235_v32 = vld [vmem:[%s2143_s1 + $0x90] sm:$0xff]  ;;  %v345_v34 = vpack.c.bf16 %v283_v29, %v281_v28  ;;  %v286_v37 = vld [vmem:[%s2143_s1 + $0x228] sm:$0xff]  ;;  %v288_v38 = vld [vmem:[%s2143_s1 + $0x238] sm:$0xff]  ;;  %s2147_s10 = smov (!%p1570_p3, %s1168_s10), 1 }
   0xe   : > { %365 = vmatprep.subr.bf16.mxu0 %v318_v15  ;;  %v240_v39 = vld [vmem:[%s2143_s1 + $0xb8] sm:$0xff]  ;;  %474 = vmatprep.subr.bf16.mxu1 %v346_v33  ;;  %v348_v40 = vpack.c.bf16 %v288_v38, %v286_v37  ;;  %v285_v41 = vld [vmem:[%s2143_s1 + $0x220] sm:$0xff]  ;;  %v287_v42 = vld [vmem:[%s2143_s1 + $0x230] sm:$0xff]  ;;  %v321_v44 = vpack.c.bf16 %v235_v32, %v233_v31  ;;  %s1339_s20 = smul.u32 384, %s2147_s10  ;;  %s1186_s28 = sshll.u32 %s2147_s10, 7 }
   0xf   : > { %475 = vmatpush1.bf16.msra.mxu1 %v345_v34  ;;  %v347_v43 = vpack.c.bf16 %v287_v42, %v285_v41  ;;  %v290_v45 = vld [vmem:[%s2143_s1 + $0x248] sm:$0xff]  ;;  %v292_v46 = vld [vmem:[%s2143_s1 + $0x258] sm:$0xff]  ;;  %v289_v47 = vld [vmem:[%s2143_s1 + $0x240] sm:$0xff]  ;;  %v324_v48 = vpack.c.bf16 %v240_v39, %v238_v36  ;;  %s2105_s3 = scalar_lea.vmem %s2144_s2, %s1186_s28 }
  0x10   : > { %476 = vmatprep.subr.bf16.mxu1 %v348_v40  ;;  %v237_v49 = vld [vmem:[%s2143_s1 + $0xa0] sm:$0xff]  ;;  %v239_v50 = vld [vmem:[%s2143_s1 + $0xb0] sm:$0xff]  ;;  %v350_v51 = vpack.c.bf16 %v292_v46, %v290_v45  ;;  %v242_v53 = vld [vmem:[%s2143_s1 + $0xc8] sm:$0xff]  ;;  %s1662_s17 = scalar_lea.vmem %s2142_s0, %s1339_s20 }
  0x11   : > { %366 = vmatpush1.bf16.msra.mxu0 %v317_v20  ;;  %v291_v52 = vld [vmem:[%s2143_s1 + $0x250] sm:$0xff]  ;;  %v244_v54 = vld [vmem:[%s2143_s1 + $0xd8] sm:$0xff]  ;;  %v294_v55 = vld [vmem:[%s2143_s1 + $0x268] sm:$0xff]  ;;  %v323_v58 = vpack.c.bf16 %v239_v50, %v237_v49 }
  0x12   : > { %367 = vmatprep.subr.bf16.mxu0 %v320_v21  ;;  %v349_v56 = vpack.c.bf16 %v291_v52, %v289_v47  ;;  %v296_v57 = vld [vmem:[%s2143_s1 + $0x278] sm:$0xff]  ;;  %v241_v59 = vld [vmem:[%s2143_s1 + $0xc0] sm:$0xff]  ;;  %v295_v62 = vld [vmem:[%s2143_s1 + $0x270] sm:$0xff]  ;;  %v326_v63 = vpack.c.bf16 %v244_v54, %v242_v53 }
  0x13   : > { %477 = vmatpush1.bf16.msra.mxu1 %v347_v43  ;;  %v352_v60 = vpack.c.bf16 %v296_v57, %v294_v55  ;;  %v293_v61 = vld [vmem:[%s2143_s1 + $0x260] sm:$0xff]  ;;  %v243_v0 = vld [vmem:[%s2143_s1 + $0xd0] sm:$0xff]  ;;  %v298_v1 = vld [vmem:[%s2143_s1 + $0x288] sm:$0xff] }
  0x14   : > { %478 = vmatprep.subr.bf16.mxu1 %v350_v51  ;;  %v300_v2 = vld [vmem:[%s2143_s1 + $0x298] sm:$0xff]  ;;  %v246_v3 = vld [vmem:[%s2143_s1 + $0xe8] sm:$0xff]  ;;  %v351_v5 = vpack.c.bf16 %v295_v62, %v293_v61  ;;  %v325_v6 = vpack.c.bf16 %v243_v0, %v241_v59  ;;  %v245_v8 = vld [vmem:[%s2143_s1 + $0xe0] sm:$0xff] }
  0x15   : > { %368 = vmatpush1.bf16.msra.mxu0 %v319_v30  ;;  %v248_v4 = vld [vmem:[%s2143_s1 + $0xf8] sm:$0xff]  ;;  %v354_v9 = vpack.c.bf16 %v300_v2, %v298_v1  ;;  %v297_v10 = vld [vmem:[%s2143_s1 + $0x280] sm:$0xff]  ;;  %v299_v11 = vld [vmem:[%s2143_s1 + $0x290] sm:$0xff] }
  0x16   : > { %369 = vmatprep.subr.bf16.mxu0 %v322_v35  ;;  %v328_v12 = vpack.c.bf16 %v248_v4, %v246_v3  ;;  %v247_v13 = vld [vmem:[%s2143_s1 + $0xf0] sm:$0xff]  ;;  %v302_v14 = vld [vmem:[%s2143_s1 + $0x2a8] sm:$0xff]  ;;  %v304_v15 = vld [vmem:[%s2143_s1 + $0x2b8] sm:$0xff]  ;;  %v353_v18 = vpack.c.bf16 %v299_v11, %v297_v10 }
  0x17   : > { %479 = vmatpush1.bf16.msra.mxu1 %v349_v56  ;;  %v250_v16 = vld [vmem:[%s2143_s1 + $0x108] sm:$0xff]  ;;  %v252_v17 = vld [vmem:[%s2143_s1 + $0x118] sm:$0xff]  ;;  %v327_v19 = vpack.c.bf16 %v247_v13, %v245_v8  ;;  %v249_v20 = vld [vmem:[%s2143_s1 + $0x100] sm:$0xff]  ;;  %v356_v21 = vpack.c.bf16 %v304_v15, %v302_v14 }
  0x18   : > { %480 = vmatprep.subr.bf16.mxu1 %v352_v60  ;;  %v301_v22 = vld [vmem:[%s2143_s1 + $0x2a0] sm:$0xff]  ;;  %v303_v23 = vld [vmem:[%s2143_s1 + $0x2b0] sm:$0xff]  ;;  %v330_v24 = vpack.c.bf16 %v252_v17, %v250_v16  ;;  %v306_v26 = vld [vmem:[%s2143_s1 + $0x2c8] sm:$0xff] }
  0x19   : > { %370 = vmatpush1.bf16.msra.mxu0 %v321_v44  ;;  %v251_v25 = vld [vmem:[%s2143_s1 + $0x110] sm:$0xff]  ;;  %v308_v27 = vld [vmem:[%s2143_s1 + $0x2d8] sm:$0xff]  ;;  %v254_v28 = vld [vmem:[%s2143_s1 + $0x128] sm:$0xff]  ;;  %v355_v32 = vpack.c.bf16 %v303_v23, %v301_v22 }
  0x1a   : > { %371 = vmatprep.subr.bf16.mxu0 %v324_v48  ;;  %v256_v29 = vld [vmem:[%s2143_s1 + $0x138] sm:$0xff]  ;;  %v253_v30 = vld [vmem:[%s2143_s1 + $0x120] sm:$0xff]  ;;  %v255_v31 = vld [vmem:[%s2143_s1 + $0x130] sm:$0xff]  ;;  %v329_v33 = vpack.c.bf16 %v251_v25, %v249_v20  ;;  %v358_v34 = vpack.c.bf16 %v308_v27, %v306_v26 }
  0x1b   : > { %481 = vmatpush1.bf16.msra.mxu1 %v351_v5  ;;  %v305_v35 = vld [vmem:[%s2143_s1 + $0x2c0] sm:$0xff]  ;;  %v307_v36 = vld [vmem:[%s2143_s1 + $0x2d0] sm:$0xff]  ;;  %v146_v37 = vld [vmem:[%s1662_s17 + $0x8] sm:$0xff]  ;;  %v332_v38 = vpack.c.bf16 %v256_v29, %v254_v28  ;;  %v331_v46 = vpack.c.bf16 %v255_v31, %v253_v30 }
  0x1c   : > { %482 = vmatprep.subr.bf16.mxu1 %v354_v9  ;;  %v310_v39 = vld [vmem:[%s2143_s1 + $0x2e8] sm:$0xff]  ;;  %v312_v40 = vld [vmem:[%s2143_s1 + $0x2f8] sm:$0xff]  ;;  %v149_v41 = vld [vmem:[%s1662_s17 + $0x20] sm:$0xff]  ;;  %v357_v45 = vpack.c.bf16 %v307_v36, %v305_v35 }
  0x1d   : > { %372 = vmatpush1.bf16.msra.mxu0 %v323_v58  ;;  %v258_v42 = vld [vmem:[%s2143_s1 + $0x148] sm:$0xff]  ;;  %v260_v43 = vld [vmem:[%s2143_s1 + $0x158] sm:$0xff]  ;;  %v194_v44 = vpack.c.bf16 %v149_v41, %v146_v37  ;;  %v360_v47 = vpack.c.bf16 %v312_v40, %v310_v39  ;;  %v309_v48 = vld [vmem:[%s2143_s1 + $0x2e0] sm:$0xff] }
  0x1e   : > { %373 = vmatprep.subr.bf16.mxu0 %v326_v63  ;;  %v311_v49 = vld [vmem:[%s2143_s1 + $0x2f0] sm:$0xff]  ;;  %v334_v50 = vpack.c.bf16 %v260_v43, %v258_v42  ;;  %v257_v51 = vld [vmem:[%s2143_s1 + $0x140] sm:$0xff]  ;;  %v262_v53 = vld [vmem:[%s2143_s1 + $0x168] sm:$0xff] }
  0x1f   : > { %483 = vmatpush1.bf16.msra.mxu1 %v353_v18  ;;  %v259_v52 = vld [vmem:[%s2143_s1 + $0x150] sm:$0xff]  ;;  %393 = vmatprep.mubr.bf16.mxu0 %v194_v44  ;;  %v264_v54 = vld [vmem:[%s2143_s1 + $0x178] sm:$0xff]  ;;  %v359_v55 = vpack.c.bf16 %v311_v49, %v309_v48  ;;  %v150_v57 = vld [vmem:[%s1662_s17 + $0x28] sm:$0xff] }
  0x20   : > { %484 = vmatprep.subr.bf16.mxu1 %v356_v21  ;;  %v147_v56 = vld [vmem:[%s1662_s17 + $0x10] sm:$0xff]  ;;  %v333_v58 = vpack.c.bf16 %v259_v52, %v257_v51  ;;  %v336_v59 = vpack.c.bf16 %v264_v54, %v262_v53  ;;  %v261_v60 = vld [vmem:[%s2143_s1 + $0x160] sm:$0xff]  ;;  %v266_v62 = vld [vmem:[%s2143_s1 + $0x188] sm:$0xff] }
  0x21   : > { %374 = vmatpush1.bf16.msra.mxu0 %v325_v6  ;;  %v263_v61 = vld [vmem:[%s2143_s1 + $0x170] sm:$0xff]  ;;  %v268_v63 = vld [vmem:[%s2143_s1 + $0x198] sm:$0xff]  ;;  %v195_v0 = vpack.c.bf16 %v150_v57, %v147_v56  ;;  %v265_v3 = vld [vmem:[%s2143_s1 + $0x180] sm:$0xff] }
  0x22   : > { %375 = vmatprep.subr.bf16.mxu0 %v328_v12  ;;  %v335_v1 = vpack.c.bf16 %v263_v61, %v261_v60  ;;  %v338_v2 = vpack.c.bf16 %v268_v63, %v266_v62  ;;  %v267_v4 = vld [vmem:[%s2143_s1 + $0x190] sm:$0xff]  ;;  %v270_v5 = vld [vmem:[%s2143_s1 + $0x1a8] sm:$0xff]  ;;  %v272_v6 = vld [vmem:[%s2143_s1 + $0x1b8] sm:$0xff] }
  0x23   : > { %485 = vmatpush1.bf16.msra.mxu1 %v355_v32  ;;  %v153_v8 = vld [vmem:[%s1662_s17 + $0x40] sm:$0xff]  ;;  %v156_v9 = vld [vmem:[%s1662_s17 + $0x58] sm:$0xff]  ;;  %v337_v10 = vpack.c.bf16 %v267_v4, %v265_v3  ;;  %v340_v11 = vpack.c.bf16 %v272_v6, %v270_v5  ;;  %v271_v13 = vld [vmem:[%s2143_s1 + $0x1b0] sm:$0xff] }
  0x24   : > { %486 = vmatprep.subr.bf16.mxu1 %v358_v34  ;;  %v269_v12 = vld [vmem:[%s2143_s1 + $0x1a0] sm:$0xff]  ;;  %v274_v14 = vld [vmem:[%s2143_s1 + $0x1c8] sm:$0xff]  ;;  %v276_v15 = vld [vmem:[%s2143_s1 + $0x1d8] sm:$0xff]  ;;  %v198_v16 = vpack.c.bf16 %v156_v9, %v153_v8 }
  0x25   : > { %376 = vmatpush1.bf16.msra.mxu0 %v327_v19  ;;  %v339_v17 = vpack.c.bf16 %v271_v13, %v269_v12  ;;  %v342_v18 = vpack.c.bf16 %v276_v15, %v274_v14  ;;  %v273_v19 = vld [vmem:[%s2143_s1 + $0x1c0] sm:$0xff]  ;;  %v275_v20 = vld [vmem:[%s2143_s1 + $0x1d0] sm:$0xff]  ;;  %v278_v21 = vld [vmem:[%s2143_s1 + $0x1e8] sm:$0xff] }
  0x26   : > { %377 = vmatprep.subr.bf16.mxu0 %v330_v24  ;;  %v280_v22 = vld [vmem:[%s2143_s1 + $0x1f8] sm:$0xff]  ;;  %v159_v23 = vld [vmem:[%s1662_s17 + $0x70] sm:$0xff]  ;;  %v162_v24 = vld [vmem:[%s1662_s17 + $0x88] sm:$0xff]  ;;  %v341_v25 = vpack.c.bf16 %v275_v20, %v273_v19 }
  0x27   : > { %487 = vmatpush1.bf16.msra.mxu1 %v357_v45  ;;  %v344_v26 = vpack.c.bf16 %v280_v22, %v278_v21  ;;  %v277_v27 = vld [vmem:[%s2143_s1 + $0x1e0] sm:$0xff]  ;;  %v279_v28 = vld [vmem:[%s2143_s1 + $0x1f0] sm:$0xff]  ;;  %v201_v29 = vpack.c.bf16 %v162_v24, %v159_v23  ;;  %v148_v32 = vld [vmem:[%s1662_s17 + $0x18] sm:$0xff] }
  0x28   : > { %488 = vmatprep.subr.bf16.mxu1 %v360_v47  ;;  %v343_v30 = vpack.c.bf16 %v279_v28, %v277_v27  ;;  %v145_v31 = vld [vmem:[%s1662_s17] sm:$0xff]  ;;  %v155_v34 = vld [vmem:[%s1662_s17 + $0x50] sm:$0xff]  ;;  %v168_v37 = vld [vmem:[%s1662_s17 + $0xb8] sm:$0xff] }
  0x29   : > { %378 = vmatpush1.bf16.msra.mxu0 %v329_v33  ;;  %v152_v33 = vld [vmem:[%s1662_s17 + $0x38] sm:$0xff]  ;;  %v193_v35 = vpack.c.bf16 %v148_v32, %v145_v31  ;;  %v165_v36 = vld [vmem:[%s1662_s17 + $0xa0] sm:$0xff]  ;;  %v151_v40 = vld [vmem:[%s1662_s17 + $0x30] sm:$0xff] }
  0x2a   : > { %379 = vmatprep.subr.bf16.mxu0 %v332_v38  ;;  %v197_v38 = vpack.c.bf16 %v155_v34, %v152_v33  ;;  %v204_v39 = vpack.c.bf16 %v168_v37, %v165_v36  ;;  %v154_v41 = vld [vmem:[%s1662_s17 + $0x48] sm:$0xff]  ;;  %v161_v43 = vld [vmem:[%s1662_s17 + $0x80] sm:$0xff]  ;;  %v171_v45 = vld [vmem:[%s1662_s17 + $0xd0] sm:$0xff] }
  0x2b   : > { %489 = vmatpush1.bf16.msra.mxu1 %v359_v55  ;;  %v158_v42 = vld [vmem:[%s1662_s17 + $0x68] sm:$0xff]  ;;  %v196_v44 = vpack.c.bf16 %v154_v41, %v151_v40  ;;  %v157_v49 = vld [vmem:[%s1662_s17 + $0x60] sm:$0xff]  ;;  %v164_v51 = vld [vmem:[%s1662_s17 + $0x98] sm:$0xff] }
  0x2c   : > { %v200_v47 = vpack.c.bf16 %v161_v43, %v158_v42  ;;  %v167_v52 = vld [vmem:[%s1662_s17 + $0xb0] sm:$0xff]  ;;  %v177_v54 = vld [vmem:[%s1662_s17 + $0x100] sm:$0xff]  ;;  %v180_v55 = vld [vmem:[%s1662_s17 + $0x118] sm:$0xff] }
  0x2d   : > { %380 = vmatpush1.bf16.msra.mxu0 %v331_v46  ;;  %v174_v46 = vld [vmem:[%s1662_s17 + $0xe8] sm:$0xff]  ;;  %v203_v56 = vpack.c.bf16 %v167_v52, %v164_v51  ;;  %v210_v57 = vpack.c.bf16 %v180_v55, %v177_v54  ;;  %v173_v61 = vld [vmem:[%s1662_s17 + $0xe0] sm:$0xff]  ;;  %v183_v63 = vld [vmem:[%s1662_s17 + $0x130] sm:$0xff] }
  0x2e   : > { %381 = vmatprep.subr.bf16.mxu0 %v334_v50  ;;  %507 = vmatmul.mubr.bf16.vlgmr.msra.gmra.mrb[0].mxu1 %v195_v0  ;;  %v207_v48 = vpack.c.bf16 %v174_v46, %v171_v45  ;;  %v160_v50 = vld [vmem:[%s1662_s17 + $0x78] sm:$0xff]  ;;  %v170_v60 = vld [vmem:[%s1662_s17 + $0xc8] sm:$0xff]  ;;  %v169_v3 = vld [vmem:[%s1662_s17 + $0xc0] sm:$0xff] }
  0x2f   : > { %516 = vmatprep.mubr.bf16.mxu1 %v1422_v7  ;;  %v199_v53 = vpack.c.bf16 %v160_v50, %v157_v49  ;;  %v186_v0 = vld [vmem:[%s1662_s17 + $0x148] sm:$0xff]  ;;  %v172_v4 = vld [vmem:[%s1662_s17 + $0xd8] sm:$0xff]  ;;  %v179_v6 = vld [vmem:[%s1662_s17 + $0x110] sm:$0xff] }
  0x30   : > { %v176_v5 = vld [vmem:[%s1662_s17 + $0xf8] sm:$0xff]  ;;  %v205_v8 = vpack.c.bf16 %v172_v4, %v169_v3  ;;  %v189_v9 = vld [vmem:[%s1662_s17 + $0x160] sm:$0xff]  ;;  %v175_v13 = vld [vmem:[%s1662_s17 + $0xf0] sm:$0xff] }
  0x31   : > { %382 = vmatpush1.bf16.msra.mxu0 %v333_v58  ;;  %v163_v58 = vld [vmem:[%s1662_s17 + $0x90] sm:$0xff]  ;;  %v178_v14 = vld [vmem:[%s1662_s17 + $0x108] sm:$0xff]  ;;  %v184_v19 = vld [vmem:[%s1662_s17 + $0x138] sm:$0xff] }
  0x32   : > { %383 = vmatprep.subr.bf16.mxu0 %v336_v59  ;;  %v166_v59 = vld [vmem:[%s1662_s17 + $0xa8] sm:$0xff]  ;;  %v188_v20 = vld [vmem:[%s1662_s17 + $0x158] sm:$0xff]  ;;  %v191_v21 = vld [vmem:[%s1662_s17 + $0x170] sm:$0xff] }
  0x33   : > { %v202_v62 = vpack.c.bf16 %v166_v59, %v163_v58  ;;  %v182_v15 = vld [vmem:[%s1662_s17 + $0x128] sm:$0xff]  ;;  %v215_v23 = vpack.c.bf16 %v191_v21, %v188_v20  ;;  %v187_v24 = vld [vmem:[%s1662_s17 + $0x150] sm:$0xff] }
  0x35   : > { %384 = vmatpush1.bf16.msra.mxu0 %v335_v1  ;;  %v206_v1 = vpack.c.bf16 %v173_v61, %v170_v60 }
  0x36   : > { %385 = vmatprep.subr.bf16.mxu0 %v338_v2  ;;  %517 = vmatmul.mubr.bf16.gmra.mrb[4].mxu1 %v198_v16  ;;  %v213_v2 = vpack.c.bf16 %v186_v0, %v183_v63  ;;  %v185_v16 = vld [vmem:[%s1662_s17 + $0x140] sm:$0xff] }
  0x37   : > { %526 = vmatprep.mubr.bf16.mxu1 %v1422_v7 }
  0x39   : > { %386 = vmatpush1.bf16.msra.mxu0 %v337_v10  ;;  %v192_v10 = vld [vmem:[%s1662_s17 + $0x178] sm:$0xff] }
  0x3a   : > { %387 = vmatprep.subr.bf16.mxu0 %v340_v11  ;;  %v209_v11 = vpack.c.bf16 %v179_v6, %v176_v5  ;;  %v216_v12 = vpack.c.bf16 %v192_v10, %v189_v9 }
  0x3d   : > { %388 = vmatpush1.bf16.msra.mxu0 %v339_v17  ;;  %v208_v17 = vpack.c.bf16 %v178_v14, %v175_v13 }
  0x3e   : > { %389 = vmatprep.subr.bf16.mxu0 %v342_v18  ;;  %527 = vmatmul.mubr.bf16.gmra.mrb[8].mxu1 %v201_v29  ;;  %v212_v18 = vpack.c.bf16 %v185_v16, %v182_v15 }
  0x3f   : > { %536 = vmatprep.mubr.bf16.mxu1 %v1422_v7 }
  0x41   : > { %390 = vmatpush1.bf16.msra.mxu0 %v341_v25  ;;  %v190_v25 = vld [vmem:[%s1662_s17 + $0x168] sm:$0xff] }
  0x42   : > { %391 = vmatprep.subr.bf16.mxu0 %v344_v26  ;;  %v214_v26 = vpack.c.bf16 %v190_v25, %v187_v24 }
  0x45   : > { %392 = vmatpush1.bf16.msra.mxu0 %v343_v30 }
  0x46   : > { %537 = vmatmul.mubr.bf16.gmra.mrb[12].mxu1 %v204_v39 }
  0x47   : > { %546 = vmatprep.mubr.bf16.mxu1 %v1422_v7 }
  0x48   : > { %394 = vmatmul.mubr.bf16.vlgmr.msra.gmra.mrb[0].mxu0 %v193_v35 }
  0x49   : > { %403 = vmatprep.mubr.bf16.mxu0 %v197_v38 }
  0x4e   : > { %547 = vmatmul.mubr.bf16.gmra.mrb[16].mxu1 %v207_v48 }
  0x4f   : > { %556 = vmatprep.mubr.bf16.mxu1 %v1422_v7 }
  0x50   : > { %404 = vmatmul.mubr.bf16.gmra.mrb[4].mxu0 %v196_v44 }
  0x51   : > { %413 = vmatprep.mubr.bf16.mxu0 %v200_v47 }
  0x56   : > { %557 = vmatmul.mubr.bf16.gmra.mrb[20].mxu1 %v210_v57 }
  0x57   : > { %566 = vmatprep.mubr.bf16.mxu1 %v1422_v7 }
  0x58   : > { %414 = vmatmul.mubr.bf16.gmra.mrb[8].mxu0 %v199_v53 }
  0x59   : > { %423 = vmatprep.mubr.bf16.mxu0 %v203_v56 }
  0x5e   : > { %567 = vmatmul.mubr.bf16.gmra.mrb[24].mxu1 %v213_v2 }
  0x5f   : > { %576 = vmatprep.mubr.bf16.mxu1 %v1422_v7  ;;  %v181_v7 = vld [vmem:[%s1662_s17 + $0x120] sm:$0xff]  ;;  %s1423_s17 = smov 64  }
  0x60   : > { %424 = vmatmul.mubr.bf16.gmra.mrb[12].mxu0 %v202_v62  ;;  %v211_v22 = vpack.c.bf16 %v184_v19, %v181_v7 }
  0x61   : > { %433 = vmatprep.mubr.bf16.mxu0 %v206_v1 }
  0x66   : > { %577 = vmatmul.mubr.bf16.gmra.mrb[28].mxu1 %v216_v12 }
  0x68   : > { %434 = vmatmul.mubr.bf16.gmra.mrb[16].mxu0 %v205_v8 }
  0x69   : > { %443 = vmatprep.mubr.bf16.mxu0 %v209_v11 }
  0x70   : > { %444 = vmatmul.mubr.bf16.gmra.mrb[20].mxu0 %v208_v17 }
  0x71   : > { %453 = vmatprep.mubr.bf16.mxu0 %v212_v18 }
  0x78   : > { %454 = vmatmul.mubr.bf16.gmra.mrb[24].mxu0 %v211_v22 }
  0x79   : > { %463 = vmatprep.mubr.bf16.mxu0 %v215_v23 }
  0x80   : > { %464 = vmatmul.mubr.bf16.gmra.mrb[28].mxu0 %v214_v26 }
 0x101   : > { %v508_v27 = vpop.f32.mrb[0].mxu1 }
 0x102   : > { %v510_v28 = vpop.f32.mrb[1].mxu1 }
 0x103   : > { %v512_v29 = vpop.f32.mrb[2].mxu1 }
 0x104   : > { %v514_v30 = vpop.f32.mrb[3].mxu1 }
 0x109   : > { %v518_v31 = vpop.f32.mrb[4].mxu1 }
 0x10a   : > { %v520_v32 = vpop.f32.mrb[5].mxu1 }
 0x10b   : > { %v522_v33 = vpop.f32.mrb[6].mxu1 }
 0x10c   : > { %v524_v34 = vpop.f32.mrb[7].mxu1 }
 0x111   : > { %v528_v35 = vpop.f32.mrb[8].mxu1 }
 0x112   : > { %v530_v36 = vpop.f32.mrb[9].mxu1 }
 0x113   : > { %v532_v37 = vpop.f32.mrb[10].mxu1 }
 0x114   : > { %v534_v38 = vpop.f32.mrb[11].mxu1 }
 0x119   : > { %v538_v46 = vpop.f32.mrb[12].mxu1 }
 0x11a   : > { %v540_v48 = vpop.f32.mrb[13].mxu1 }
 0x11b   : > { %v395_v39 = vpop.f32.mrb[0].mxu0  ;;  %v542_v52 = vpop.f32.mrb[14].mxu1 }
 0x11c   : > { %v509_v40 = vadd.f32 %v508_v27, %v395_v39  ;;  %v397_v41 = vpop.f32.mrb[1].mxu0  ;;  %v544_v54 = vpop.f32.mrb[15].mxu1 }
 0x11d   : > { %v511_v42 = vadd.f32 %v510_v28, %v397_v41  ;;  %v399_v43 = vpop.f32.mrb[2].mxu0 }
 0x11e   : > { %v513_v44 = vadd.f32 %v512_v29, %v399_v43  ;;  %v401_v45 = vpop.f32.mrb[3].mxu0  ;;  %v587_v49 = vmul.f32 0.05103104, %v509_v40 }
 0x11f   : > { %v515_v47 = vadd.f32 %v514_v30, %v401_v45 }
 0x120   : > { %v588_v50 = vmul.f32 0.05103104, %v513_v44  ;;  %v611_v51 = vpack.c.bf16 %v513_v44, %v509_v40 }
 0x121   : > { %v1809_v53 = vpack.c.bf16 %v515_v47, %v511_v42  ;;  %v548_v63 = vpop.f32.mrb[16].mxu1 }
 0x122   : > { %v603_v55 = vpack.c.bf16 %v588_v50, %v587_v49  ;;  %627 = vrot.lane.b32.xlu0 %v611_v51, %s1423_s17  ;;  %v550_v1 = vpop.f32.mrb[17].mxu1 }
 0x123   : > { %v405_v56 = vpop.f32.mrb[4].mxu0  ;;  %1251 = vmatprep.subr.bf16.mxu0 %v1809_v53  ;;  %v552_v5 = vpop.f32.mrb[18].mxu1 }
 0x124   : > { %v519_v57 = vadd.f32 %v518_v31, %v405_v56  ;;  %v407_v58 = vpop.f32.mrb[5].mxu0  ;;  %1235 = vmatprep.mubr.msk.bf16.mxu1 %vm643_vm0, %v603_v55  ;;  %1252 = vmatpush3.bf16.msra.mxu0 %v1809_v53  ;;  %v554_v8 = vpop.f32.mrb[19].mxu1 }
 0x125   : > { %v521_v59 = vadd.f32 %v520_v32, %v407_v58  ;;  %v409_v60 = vpop.f32.mrb[6].mxu0 }
 0x126   : > { %v523_v61 = vadd.f32 %v522_v33, %v409_v60  ;;  %v411_v62 = vpop.f32.mrb[7].mxu0  ;;  %v1815_v2 = vmul.f32 0.05103104, %v519_v57 }
 0x127   : > { %v525_v0 = vadd.f32 %v524_v34, %v411_v62 }
 0x128   : > { %v1817_v3 = vmul.f32 0.05103104, %v523_v61  ;;  %v612_v4 = vpack.c.bf16 %v523_v61, %v519_v57 }
 0x129   : > { %v1819_v6 = vpack.c.bf16 %v525_v0, %v521_v59  ;;  %v558_v17 = vpop.f32.mrb[20].mxu1 }
 0x12a   : > { %v604_v9 = vpack.c.bf16 %v1817_v3, %v1815_v2  ;;  %629 = vrot.lane.b32.xlu0 %v612_v4, %s1423_s17  ;;  %v560_v7 = vpop.f32.mrb[21].mxu1 }
 0x12b   : > { %v415_v10 = vpop.f32.mrb[8].mxu0  ;;  %1253 = vmatprep.subr.bf16.mxu0 %v1819_v6  ;;  %v562_v22 = vpop.f32.mrb[22].mxu1 }
 0x12c   : > { %v529_v11 = vadd.f32 %v528_v35, %v415_v10  ;;  %v417_v12 = vpop.f32.mrb[9].mxu0  ;;  %1254 = vmatpush3.bf16.msra.mxu0 %v1819_v6  ;;  %v564_v24 = vpop.f32.mrb[23].mxu1 }
 0x12d   : > { %v531_v13 = vadd.f32 %v530_v36, %v417_v12  ;;  %v419_v14 = vpop.f32.mrb[10].mxu0 }
 0x12e   : > { %v533_v15 = vadd.f32 %v532_v37, %v419_v14  ;;  %v421_v16 = vpop.f32.mrb[11].mxu0  ;;  %v1826_v19 = vmul.f32 0.05103104, %v529_v11 }
 0x12f   : > { %v535_v18 = vadd.f32 %v534_v38, %v421_v16 }
 0x130   : > { %v1828_v20 = vmul.f32 0.05103104, %v533_v15  ;;  %v613_v21 = vpack.c.bf16 %v533_v15, %v529_v11 }
 0x131   : > { %v1830_v23 = vpack.c.bf16 %v535_v18, %v531_v13  ;;  %v568_v33 = vpop.f32.mrb[24].mxu1 }
 0x132   : > { %v605_v25 = vpack.c.bf16 %v1828_v20, %v1826_v19  ;;  %631 = vrot.lane.b32.xlu1 %v613_v21, %s1423_s17  ;;  %v570_v35 = vpop.f32.mrb[25].mxu1 }
 0x133   : > { %v425_v26 = vpop.f32.mrb[12].mxu0  ;;  %1255 = vmatprep.subr.bf16.mxu0 %v1830_v23  ;;  %v572_v39 = vpop.f32.mrb[26].mxu1 }
 0x134   : > { %v539_v27 = vadd.f32 %v538_v46, %v425_v26  ;;  %v427_v28 = vpop.f32.mrb[13].mxu0  ;;  %1256 = vmatpush3.bf16.msra.mxu0 %v1830_v23  ;;  %v574_v41 = vpop.f32.mrb[27].mxu1 }
 0x135   : > { %v541_v29 = vadd.f32 %v540_v48, %v427_v28  ;;  %v429_v30 = vpop.f32.mrb[14].mxu0 }
 0x136   : > { %v543_v31 = vadd.f32 %v542_v52, %v429_v30  ;;  %v431_v32 = vpop.f32.mrb[15].mxu0  ;;  %v1837_v36 = vmul.f32 0.05103104, %v539_v27 }
 0x137   : > { %v545_v34 = vadd.f32 %v544_v54, %v431_v32 }
 0x138   : > { %v1839_v37 = vmul.f32 0.05103104, %v543_v31  ;;  %v614_v38 = vpack.c.bf16 %v543_v31, %v539_v27 }
 0x139   : > { %v1841_v40 = vpack.c.bf16 %v545_v34, %v541_v29  ;;  %v578_v50 = vpop.f32.mrb[28].mxu1 }
 0x13a   : > { %v606_v42 = vpack.c.bf16 %v1839_v37, %v1837_v36  ;;  %633 = vrot.lane.b32.xlu1 %v614_v38, %s1423_s17  ;;  %v580_v52 = vpop.f32.mrb[29].mxu1 }
 0x13b   : > { %v435_v43 = vpop.f32.mrb[16].mxu0  ;;  %1257 = vmatprep.subr.bf16.mxu0 %v1841_v40  ;;  %v582_v57 = vpop.f32.mrb[30].mxu1 }
 0x13c   : > { %v549_v44 = vadd.f32 %v548_v63, %v435_v43  ;;  %v437_v45 = vpop.f32.mrb[17].mxu0  ;;  %1258 = vmatpush3.bf16.msra.mxu0 %v1841_v40  ;;  %v584_v59 = vpop.f32.mrb[31].mxu1 }
 0x13d   : > { %v551_v46 = vadd.f32 %v550_v1, %v437_v45  ;;  %v439_v47 = vpop.f32.mrb[18].mxu0 }
 0x13e   : > { %v553_v48 = vadd.f32 %v552_v5, %v439_v47  ;;  %v441_v49 = vpop.f32.mrb[19].mxu0  ;;  %v1848_v54 = vmul.f32 0.05103104, %v549_v44 }
 0x13f   : > { %v555_v51 = vadd.f32 %v554_v8, %v441_v49 }
 0x140   : > { %v1850_v55 = vmul.f32 0.05103104, %v553_v48  ;;  %v615_v56 = vpack.c.bf16 %v553_v48, %v549_v44 }
 0x141   : > { %v1852_v58 = vpack.c.bf16 %v555_v51, %v551_v46 }
 0x142   : > { %v607_v60 = vpack.c.bf16 %v1850_v55, %v1848_v54  ;;  %635 = vrot.lane.b32.xlu0 %v615_v56, %s1423_s17 }
 0x143   : > { %v445_v61 = vpop.f32.mrb[20].mxu0  ;;  %1259 = vmatprep.subr.bf16.mxu0 %v1852_v58 }
 0x144   : > { %v559_v62 = vadd.f32 %v558_v17, %v445_v61  ;;  %v447_v63 = vpop.f32.mrb[21].mxu0  ;;  %1260 = vmatpush3.bf16.msra.mxu0 %v1852_v58 }
 0x145   : > { %v561_v0 = vadd.f32 %v560_v7, %v447_v63  ;;  %v449_v1 = vpop.f32.mrb[22].mxu0 }
 0x146   : > { %v563_v4 = vadd.f32 %v562_v22, %v449_v1  ;;  %v451_v5 = vpop.f32.mrb[23].mxu0  ;;  %v1859_v10 = vmul.f32 0.05103104, %v559_v62 }
 0x147   : > { %v565_v8 = vadd.f32 %v564_v24, %v451_v5 }
 0x148   : > { %v1861_v11 = vmul.f32 0.05103104, %v563_v4  ;;  %v616_v12 = vpack.c.bf16 %v563_v4, %v559_v62 }
 0x149   : > { %v1863_v13 = vpack.c.bf16 %v565_v8, %v561_v0 }
 0x14a   : > { %v608_v14 = vpack.c.bf16 %v1861_v11, %v1859_v10  ;;  %637 = vrot.lane.b32.xlu1 %v616_v12, %s1423_s17 }
 0x14b   : > { %v455_v15 = vpop.f32.mrb[24].mxu0  ;;  %1261 = vmatprep.subr.bf16.mxu0 %v1863_v13 }
 0x14c   : > { %v569_v16 = vadd.f32 %v568_v33, %v455_v15  ;;  %v457_v17 = vpop.f32.mrb[25].mxu0  ;;  %1262 = vmatpush3.bf16.msra.mxu0 %v1863_v13 }
 0x14d   : > { %v571_v18 = vadd.f32 %v570_v35, %v457_v17  ;;  %v459_v7 = vpop.f32.mrb[26].mxu0 }
 0x14e   : > { %v573_v21 = vadd.f32 %v572_v39, %v459_v7  ;;  %v461_v22 = vpop.f32.mrb[27].mxu0  ;;  %v1870_v26 = vmul.f32 0.05103104, %v569_v16 }
 0x14f   : > { %v575_v24 = vadd.f32 %v574_v41, %v461_v22 }
 0x150   : > { %v1872_v27 = vmul.f32 0.05103104, %v573_v21  ;;  %v617_v28 = vpack.c.bf16 %v573_v21, %v569_v16 }
 0x151   : > { %v1874_v29 = vpack.c.bf16 %v575_v24, %v571_v18 }
 0x152   : > { %v609_v30 = vpack.c.bf16 %v1872_v27, %v1870_v26  ;;  %639 = vrot.lane.b32.xlu0 %v617_v28, %s1423_s17 }
 0x153   : > { %v465_v31 = vpop.f32.mrb[28].mxu0  ;;  %1263 = vmatprep.subr.bf16.mxu0 %v1874_v29 }
 0x154   : > { %v579_v32 = vadd.f32 %v578_v50, %v465_v31  ;;  %v467_v33 = vpop.f32.mrb[29].mxu0  ;;  %1264 = vmatpush3.bf16.msra.mxu0 %v1874_v29 }
 0x155   : > { %v581_v34 = vadd.f32 %v580_v52, %v467_v33  ;;  %v469_v35 = vpop.f32.mrb[30].mxu0 }
 0x156   : > { %v583_v38 = vadd.f32 %v582_v57, %v469_v35  ;;  %v471_v39 = vpop.f32.mrb[31].mxu0  ;;  %v601_v43 = vmul.f32 0.05103104, %v579_v32 }
 0x157   : > { %v585_v41 = vadd.f32 %v584_v59, %v471_v39 }
 0x158   : > { %v602_v44 = vmul.f32 0.05103104, %v583_v38  ;;  %v618_v45 = vpack.c.bf16 %v583_v38, %v579_v32 }
 0x159   : > { %v999_v46 = vpack.c.bf16 %v585_v41, %v581_v34 }
 0x15a   : > { %v610_v47 = vpack.c.bf16 %v602_v44, %v601_v43  ;;  %641 = vrot.lane.b32.xlu1 %v618_v45, %s1423_s17 }
 0x15b   : > { %1265 = vmatprep.subr.bf16.mxu0 %v999_v46 }
 0x15c   : > { %1266 = vmatpush3.bf16.msra.mxu0 %v999_v46 }
 0x194   : > { %v628_v48 = vpop.permute.xlu0 %627 }
 0x195   : > { %v669_v49 = vsel %vm643_vm0, %v628_v48, 0  ;;  %1331 = vmatprep.subr.msk.bf16.mxu1 %vm643_vm0, %v628_v48 }
 0x196   : > { %1220 = vmatpush3.bf16.xpose.msra.mxu1 %v669_v49 }
 0x19c   : > { %v630_v50 = vpop.permute.xlu0 %629 }
 0x19d   : > { %v672_v51 = vsel %vm643_vm0, %v630_v50, 0  ;;  %1332 = vmatprep.subr.msk.bf16.mxu1 %vm643_vm0, %v630_v50 }
 0x19e   : > { %1222 = vmatpush3.bf16.xpose.msra.mxu1 %v672_v51 }
 0x1a4   : > { %v632_v52 = vpop.permute.xlu1 %631 }
 0x1a5   : > { %v675_v56 = vsel %vm643_vm0, %v632_v52, 0  ;;  %1333 = vmatprep.subr.msk.bf16.mxu1 %vm643_vm0, %v632_v52 }
 0x1a6   : > { %1224 = vmatpush3.bf16.xpose.msra.mxu1 %v675_v56 }
 0x1ac   : > { %v634_v57 = vpop.permute.xlu1 %633 }
 0x1ad   : > { %v678_v59 = vsel %vm643_vm0, %v634_v57, 0  ;;  %1334 = vmatprep.subr.msk.bf16.mxu1 %vm643_vm0, %v634_v57 }
 0x1ae   : > { %1226 = vmatpush3.bf16.xpose.msra.mxu1 %v678_v59 }
 0x1b4   : > { %v636_v61 = vpop.permute.xlu0 %635 }
 0x1b5   : > { %v681_v62 = vsel %vm643_vm0, %v636_v61, 0  ;;  %1335 = vmatprep.subr.msk.bf16.mxu1 %vm643_vm0, %v636_v61 }
 0x1b6   : > { %1228 = vmatpush3.bf16.xpose.msra.mxu1 %v681_v62 }
 0x1bc   : > { %v638_v63 = vpop.permute.xlu1 %637 }
 0x1bd   : > { %v684_v0 = vsel %vm643_vm0, %v638_v63, 0  ;;  %1336 = vmatprep.subr.msk.bf16.mxu1 %vm643_vm0, %v638_v63 }
 0x1be   : > { %1230 = vmatpush3.bf16.xpose.msra.mxu1 %v684_v0 }
 0x1c4   : > { %v640_v1 = vpop.permute.xlu0 %639 }
 0x1c5   : > { %v687_v4 = vsel %vm643_vm0, %v640_v1, 0  ;;  %1337 = vmatprep.subr.msk.bf16.mxu1 %vm643_vm0, %v640_v1 }
 0x1c6   : > { %1232 = vmatpush3.bf16.xpose.msra.mxu1 %v687_v4 }
 0x1cc   : > { %v642_v5 = vpop.permute.xlu1 %641 }
 0x1cd   : > { %v690_v8 = vsel %vm643_vm0, %v642_v5, 0  ;;  %1338 = vmatprep.subr.msk.bf16.mxu1 %vm643_vm0, %v642_v5 }
 0x1ce   : > { %1234 = vmatpush3.bf16.xpose.msra.mxu1 %v690_v8 }
 0x1cf   : > { %1283 = vmatprep.subr.bf16.mxu1 %v1809_v53 }
 0x1d5   : > { %1236 = vmatmul.mubr.msk.bf16.vlgmr.msra.gmra.mrb[32].mxu1 %vm643_vm0, %v604_v9 }
 0x1d6   : > { %1239 = vmatprep.mubr.msk.bf16.mxu1 %vm643_vm0, %v605_v25  ;;  %1291 = vmatpush3.bf16.msra.mxu1 %v1809_v53  ;;  %v789_v53 = vlaneseq }
 0x1d7   : > { %1284 = vmatprep.subr.bf16.mxu1 %v1819_v6 }
 0x1d8   : > { %v1937_v2 = vshrl.u32 %v789_v53, 7 }
 0x1da   : > { %1292 = vmatpush3.bf16.msra.mxu1 %v1819_v6  ;;  %v792_v3 = vadd.s32 16, %v1937_v2  ;;  %v1940_v6 = vand.u32 127, %v789_v53  ;;  %v791_v9 = vadd.s32 8, %v1937_v2  ;;  %v793_v19 = vadd.s32 24, %v1937_v2 }
 0x1db   : > { %1285 = vmatprep.subr.bf16.mxu1 %v1830_v23  ;;  %v795_v55 = vadd.s32 40, %v1937_v2  ;;  %v798_v16 = vadd.s32 64, %v1937_v2  ;;  %v801_v7 = vadd.s32 88, %v1937_v2  ;;  %v797_v32 = vadd.s32 56, %v1937_v2 }
 0x1dc   : > { %vm810_vm1 = vcmp.le.s32.totalorder %v1940_v6, %v792_v3  ;;  %vm808_vm2 = vcmp.le.s32.totalorder %v1940_v6, %v1937_v2  ;;  %vm809_vm3 = vcmp.le.s32.totalorder %v1940_v6, %v791_v9  ;;  %vm811_vm4 = vcmp.le.s32.totalorder %v1940_v6, %v793_v19 }
 0x1dd   : > { %1240 = vmatmul.mubr.msk.bf16.gmra.mrb[36].mxu1 %vm643_vm0, %v606_v42  ;;  %vm813_vm6 = vcmp.le.s32.totalorder %v1940_v6, %v795_v55  ;;  %vm816_vm9 = vcmp.le.s32.totalorder %v1940_v6, %v798_v16  ;;  %vm819_vm10 = vcmp.le.s32.totalorder %v1940_v6, %v801_v7  ;;  %v804_v33 = vadd.s32 112, %v1937_v2 }
 0x1de   : > { %1243 = vmatprep.mubr.msk.bf16.mxu1 %vm643_vm0, %v607_v60  ;;  %1293 = vmatpush3.bf16.msra.mxu1 %v1830_v23  ;;  %v794_v60 = vadd.s32 32, %v1937_v2  ;;  %vm815_vm13 = vcmp.le.s32.totalorder %v1940_v6, %v797_v32  ;;  %v803_v44 = vadd.s32 104, %v1937_v2 }
 0x1df   : > { %1286 = vmatprep.subr.bf16.mxu1 %v1841_v40  ;;  %vm822_vm14 = vcmp.le.s32.totalorder %v1940_v6, %v804_v33 }
 0x1e0   : > { %vm812_vm7 = vcmp.le.s32.totalorder %v1940_v6, %v794_v60  ;;  %vm821_vm15 = vcmp.le.s32.totalorder %v1940_v6, %v803_v44 }
 0x1e2   : > { %1294 = vmatpush3.bf16.msra.mxu1 %v1841_v40  ;;  %v796_v40 = vadd.s32 48, %v1937_v2 }
 0x1e3   : > { %1287 = vmatprep.subr.bf16.mxu1 %v1852_v58 }
 0x1e4   : > { %vm814_vm5 = vcmp.le.s32.totalorder %v1940_v6, %v796_v40 }
 0x1e5   : > { %1244 = vmatmul.mubr.msk.bf16.gmra.mrb[40].mxu1 %vm643_vm0, %v608_v14  ;;  %v800_v14 = vadd.s32 80, %v1937_v2 }
 0x1e6   : > { %1247 = vmatprep.mubr.msk.bf16.mxu1 %vm643_vm0, %v609_v30  ;;  %1295 = vmatpush3.bf16.msra.mxu1 %v1852_v58  ;;  %v802_v30 = vadd.s32 96, %v1937_v2 }
 0x1e7   : > { %1288 = vmatprep.subr.bf16.mxu1 %v1863_v13  ;;  %vm818_vm8 = vcmp.le.s32.totalorder %v1940_v6, %v800_v14 }
 0x1e8   : > { %vm820_vm12 = vcmp.le.s32.totalorder %v1940_v6, %v802_v30 }
 0x1ea   : > { %1296 = vmatpush3.bf16.msra.mxu1 %v1863_v13 }
 0x1eb   : > { %1289 = vmatprep.subr.bf16.mxu1 %v1874_v29 }
 0x1ed   : > { %1248 = vmatmul.mubr.msk.bf16.gmra.mrb[44].mxu1 %vm643_vm0, %v610_v47  ;;  %v805_v47 = vadd.s32 120, %v1937_v2 }
 0x1ee   : > { %1297 = vmatpush3.bf16.msra.mxu1 %v1874_v29  ;;  %v799_v29 = vadd.s32 72, %v1937_v2 }
 0x1ef   : > { %1290 = vmatprep.subr.bf16.mxu1 %v999_v46 }
 0x1f0   : > { %vm817_vm11 = vcmp.le.s32.totalorder %v1940_v6, %v799_v29 }
 0x1f2   : > { %1298 = vmatpush3.bf16.msra.mxu1 %v999_v46 }
 0x2a8   : > { %v1237_v20 = vpop.f32.mrb[32].mxu1 }
 0x2a9   : > { %v726_v23 = vpop.f32.mrb[33].mxu1  ;;  %v1947_v25 = vsel %vm810_vm1, %v1237_v20, -1e+30  ;;  %vm823_vm1 = vcmp.le.s32.totalorder %v1940_v6, %v805_v47 }
 0x2aa   : > { %844 = vmax.xlane.f32.xlu1 %v1947_v25  ;;  %v1238_v36 = vpop.f32.mrb[34].mxu1  ;;  %v1951_v37 = vsel %vm808_vm2, %v726_v23, -1e+30 }
 0x2ab   : > { %840 = vmax.xlane.f32.xlu0 %v1951_v37  ;;  %v729_v42 = vpop.f32.mrb[35].mxu1  ;;  %v1960_v58 = vsel %vm811_vm4, %v1238_v36, -1e+30 }
 0x2ac   : > { %v1956_v54 = vsel %vm809_vm3, %v729_v42, -1e+30 }
 0x2ae   : > { %842 = vmax.xlane.f32.xlu1 %v1956_v54 }
 0x2af   : > { %846 = vmax.xlane.f32.xlu0 %v1960_v58 }
 0x2b0   : > { %v1241_v10 = vpop.f32.mrb[36].mxu1 }
 0x2b1   : > { %v742_v11 = vpop.f32.mrb[37].mxu1  ;;  %v1965_v12 = vsel %vm814_vm5, %v1241_v10, -1e+30 }
 0x2b2   : > { %852 = vmax.xlane.f32.xlu1 %v1965_v12  ;;  %v1242_v13 = vpop.f32.mrb[38].mxu1  ;;  %v1975_v18 = vsel %vm812_vm7, %v742_v11, -1e+30 }
 0x2b3   : > { %v745_v15 = vpop.f32.mrb[39].mxu1  ;;  %v2006_v45 = vsel %vm815_vm13, %v1242_v13, -1e+30 }
 0x2b4   : > { %v1972_v17 = vsel %vm813_vm6, %v745_v15, -1e+30 }
 0x2b5   : > { %850 = vmax.xlane.f32.xlu0 %v1972_v17 }
 0x2b6   : > { %848 = vmax.xlane.f32.xlu1 %v1975_v18 }
 0x2b8   : > { %v1245_v21 = vpop.f32.mrb[40].mxu1 }
 0x2b9   : > { %v758_v22 = vpop.f32.mrb[41].mxu1  ;;  %v1981_v24 = vsel %vm818_vm8, %v1245_v21, -1e+30 }
 0x2ba   : > { %860 = vmax.xlane.f32.xlu1 %v1981_v24  ;;  %v1246_v26 = vpop.f32.mrb[42].mxu1  ;;  %v1984_v27 = vsel %vm816_vm9, %v758_v22, -1e+30 }
 0x2bb   : > { %856 = vmax.xlane.f32.xlu0 %v1984_v27  ;;  %v761_v28 = vpop.f32.mrb[43].mxu1  ;;  %v1990_v31 = vsel %vm819_vm10, %v1246_v26, -1e+30 }
 0x2bc   : > { %v1997_v39 = vsel %vm817_vm11, %v761_v28, -1e+30 }
 0x2bf   : > { %862 = vmax.xlane.f32.xlu0 %v1990_v31 }
 0x2c0   : > { %v1249_v34 = vpop.f32.mrb[44].mxu1 }
 0x2c1   : > { %v774_v35 = vpop.f32.mrb[45].mxu1  ;;  %v2008_v46 = vsel %vm822_vm14, %v1249_v34, -1e+30 }
 0x2c2   : > { %v1250_v38 = vpop.f32.mrb[46].mxu1  ;;  %v1999_v41 = vsel %vm820_vm12, %v774_v35, -1e+30 }
 0x2c3   : > { %858 = vmax.xlane.f32.xlu0 %v1997_v39  ;;  %864 = vmax.xlane.f32.xlu1 %v1999_v41  ;;  %v777_v43 = vpop.f32.mrb[47].mxu1  ;;  %v2018_v49 = vsel %vm823_vm1, %v1250_v38, -1e+30 }
 0x2c4   : > { %v2014_v48 = vsel %vm821_vm15, %v777_v43, -1e+30 }
 0x2c7   : > { %854 = vmax.xlane.f32.xlu0 %v2006_v45  ;;  %868 = vmax.xlane.f32.xlu1 %v2008_v46 }
 0x2cb   : > { %866 = vmax.xlane.f32.xlu0 %v2014_v48 }
 0x2cf   : > { %870 = vmax.xlane.f32.xlu0 %v2018_v49 }
 0x337   : > { %v845_v50 = vpop.xlane.xlu1 %844 }
 0x338   : > { %v874_v51 = vsub.f32 %v1947_v25, %v845_v50  ;;  %v841_v52 = vpop.xlane.xlu0 %840 }
 0x339   : > { %v872_v56 = vsub.f32 %v1951_v37, %v841_v52 }
 0x33a   : > { %v892_v57 = vmul.f32 1.442695, %v874_v51 }
 0x33b   : > { %v843_v59 = vpop.xlane.xlu1 %842  ;;  %v888_v61 = vmul.f32 1.442695, %v872_v56 }
 0x33c   : > { %1350 = vpow2.f32 %v892_v57  ;;  %v847_v62 = vpop.xlane.xlu0 %846  ;;  %v873_v63 = vsub.f32 %v1956_v54, %v843_v59 }
 0x33d   : > { %v875_v0 = vsub.f32 %v1960_v58, %v847_v62  ;;  %1352 = vpow2.f32 %v888_v61 }
 0x33e   : > { %v890_v5 = vmul.f32 1.442695, %v873_v63 }
 0x33f   : > { %v894_v1 = vmul.f32 1.442695, %v875_v0  ;;  %v853_v4 = vpop.xlane.xlu1 %852 }
 0x340   : > { %v878_v54 = vsub.f32 %v1965_v12, %v853_v4 }
 0x341   : > { %1354 = vpow2.f32 %v894_v1 }
 0x342   : > { %v851_v8 = vpop.xlane.xlu0 %850  ;;  %1356 = vpow2.f32 %v890_v5  ;;  %v900_v13 = vmul.f32 1.442695, %v878_v54 }
 0x343   : > { %v877_v53 = vsub.f32 %v1972_v17, %v851_v8  ;;  %v849_v2 = vpop.xlane.xlu1 %848 }
 0x344   : > { %v876_v3 = vsub.f32 %v1975_v18, %v849_v2 }
 0x345   : > { %v898_v6 = vmul.f32 1.442695, %v877_v53 }
 0x346   : > { %v2027_v9 = vpop.eup %1350  ;;  %v896_v19 = vmul.f32 1.442695, %v876_v3 }
 0x347   : > { %v861_v20 = vpop.xlane.xlu1 %860  ;;  %924 = vadd.xlane.f32.xlu1 %v2027_v9  ;;  %v2032_v37 = vpop.eup %1352 }
 0x348   : > { %1358 = vpow2.f32 %v896_v19  ;;  %v882_v23 = vsub.f32 %v1981_v24, %v861_v20  ;;  %v857_v25 = vpop.xlane.xlu0 %856 }
 0x349   : > { %1360 = vpow2.f32 %v898_v6  ;;  %v880_v36 = vsub.f32 %v1984_v27, %v857_v25 }
 0x34a   : > { %v908_v40 = vmul.f32 1.442695, %v882_v23 }
 0x34b   : > { %v2034_v42 = vpop.eup %1354  ;;  %920 = vadd.xlane.f32.xlu1 %v2032_v37  ;;  %v904_v55 = vmul.f32 1.442695, %v880_v36 }
 0x34c   : > { %1362 = vpow2.f32 %v908_v40  ;;  %v863_v58 = vpop.xlane.xlu0 %862  ;;  %926 = vadd.xlane.f32.xlu0 %v2034_v42  ;;  %v2040_v10 = vpop.eup %1356 }
 0x34d   : > { %v883_v60 = vsub.f32 %v1990_v31, %v863_v58  ;;  %1364 = vpow2.f32 %v904_v55 }
 0x34f   : > { %v910_v11 = vmul.f32 1.442695, %v883_v60 }
 0x350   : > { %v859_v14 = vpop.xlane.xlu0 %858  ;;  %v865_v15 = vpop.xlane.xlu1 %864  ;;  %922 = vadd.xlane.f32.xlu0 %v2040_v10 }
 0x351   : > { %1366 = vpow2.f32 %v910_v11  ;;  %v881_v16 = vsub.f32 %v1997_v39, %v859_v14  ;;  %v884_v12 = vsub.f32 %v1999_v41, %v865_v15 }
 0x352   : > { %v2045_v17 = vpop.eup %1358  ;;  %1368 = vpow2.f32 %v900_v13 }
 0x353   : > { %v2047_v18 = vpop.eup %1360  ;;  %v906_v7 = vmul.f32 1.442695, %v881_v16  ;;  %928 = vadd.xlane.f32.xlu1 %v2045_v17  ;;  %v912_v21 = vmul.f32 1.442695, %v884_v12 }
 0x354   : > { %v855_v22 = vpop.xlane.xlu0 %854  ;;  %v869_v24 = vpop.xlane.xlu1 %868  ;;  %930 = vadd.xlane.f32.xlu0 %v2047_v18 }
 0x355   : > { %1370 = vpow2.f32 %v906_v7  ;;  %v879_v26 = vsub.f32 %v2006_v45, %v855_v22  ;;  %v886_v27 = vsub.f32 %v2008_v46, %v869_v24 }
 0x356   : > { %v2053_v28 = vpop.eup %1362  ;;  %1372 = vpow2.f32 %v912_v21 }
 0x357   : > { %v902_v29 = vmul.f32 1.442695, %v879_v26  ;;  %940 = vadd.xlane.f32.xlu1 %v2053_v28  ;;  %v916_v30 = vmul.f32 1.442695, %v886_v27  ;;  %v2057_v33 = vpop.eup %1364 }
 0x358   : > { %v867_v31 = vpop.xlane.xlu0 %866 }
 0x359   : > { %1374 = vpow2.f32 %v902_v29  ;;  %v885_v32 = vsub.f32 %v2014_v48, %v867_v31 }
 0x35a   : > { %1376 = vpow2.f32 %v916_v30 }
 0x35b   : > { %v2059_v34 = vpop.eup %1366  ;;  %v914_v35 = vmul.f32 1.442695, %v885_v32  ;;  %936 = vadd.xlane.f32.xlu1 %v2057_v33 }
 0x35c   : > { %942 = vadd.xlane.f32.xlu0 %v2059_v34  ;;  %v871_v38 = vpop.xlane.xlu0 %870  ;;  %v2064_v41 = vpop.eup %1368 }
 0x35d   : > { %1378 = vpow2.f32 %v914_v35  ;;  %v887_v39 = vsub.f32 %v2018_v49, %v871_v38 }
 0x35f   : > { %v2066_v43 = vpop.eup %1370  ;;  %v918_v44 = vmul.f32 1.442695, %v887_v39  ;;  %932 = vadd.xlane.f32.xlu1 %v2064_v41 }
 0x360   : > { %938 = vadd.xlane.f32.xlu0 %v2066_v43  ;;  %v2070_v45 = vpop.eup %1372 }
 0x361   : > { %1380 = vpow2.f32 %v918_v44 }
 0x363   : > { %v2072_v46 = vpop.eup %1374  ;;  %944 = vadd.xlane.f32.xlu1 %v2070_v45 }
 0x364   : > { %934 = vadd.xlane.f32.xlu0 %v2072_v46  ;;  %v2076_v47 = vpop.eup %1376 }
 0x367   : > { %v2078_v48 = vpop.eup %1378  ;;  %948 = vadd.xlane.f32.xlu1 %v2076_v47 }
 0x368   : > { %946 = vadd.xlane.f32.xlu0 %v2078_v48 }
 0x36b   : > { %v2082_v49 = vpop.eup %1380 }
 0x36c   : > { %950 = vadd.xlane.f32.xlu0 %v2082_v49 }
 0x3d4   : > { %v925_v50 = vpop.xlane.xlu1 %924 }
 0x3d8   : > { %v921_v51 = vpop.xlane.xlu1 %920 }
 0x3d9   : > { %v927_v52 = vpop.xlane.xlu0 %926 }
 0x3da   : > { %1382 = vrcp.f32 %v927_v52 }
 0x3db   : > { %1384 = vrcp.f32 %v921_v51 }
 0x3dc   : > { %1386 = vrcp.f32 %v925_v50 }
 0x3dd   : > { %v923_v56 = vpop.xlane.xlu0 %922 }
 0x3de   : > { %1388 = vrcp.f32 %v923_v56 }
 0x3e0   : > { %v929_v57 = vpop.xlane.xlu1 %928 }
 0x3e1   : > { %1390 = vrcp.f32 %v929_v57  ;;  %v931_v59 = vpop.xlane.xlu0 %930 }
 0x3e2   : > { %1392 = vrcp.f32 %v931_v59 }
 0x3e4   : > { %v941_v61 = vpop.xlane.xlu1 %940  ;;  %v1383_v62 = vpop.eup %1382 }
 0x3e5   : > { %v1385_v63 = vpop.eup %1384  ;;  %v971_v4 = vmul.f32 %v1383_v62, %v2034_v42 }
 0x3e6   : > { %v1387_v0 = vpop.eup %1386  ;;  %v968_v53 = vmul.f32 %v1385_v63, %v2032_v37 }
 0x3e7   : > { %v970_v3 = vmul.f32 %v1387_v0, %v2027_v9 }
 0x3e8   : > { %v1389_v1 = vpop.eup %1388  ;;  %v937_v5 = vpop.xlane.xlu1 %936 }
 0x3e9   : > { %v943_v8 = vpop.xlane.xlu0 %942  ;;  %v969_v2 = vmul.f32 %v1389_v1, %v2040_v10  ;;  %v985_v25 = vpack.c.bf16 %v971_v4, %v970_v3 }
 0x3ea   : > { %1394 = vrcp.f32 %v943_v8 }
 0x3eb   : > { %v1391_v6 = vpop.eup %1390  ;;  %v984_v19 = vpack.c.bf16 %v969_v2, %v968_v53  ;;  %1396 = vrcp.f32 %v937_v5 }
 0x3ec   : > { %v1393_v20 = vpop.eup %1392  ;;  %v933_v23 = vpop.xlane.xlu1 %932  ;;  %v972_v36 = vmul.f32 %v1391_v6, %v2045_v17  ;;  %1398 = vrcp.f32 %v941_v61 }
 0x3ed   : > { %1267 = vmatprep.mubr.bf16.mxu0 %v984_v19  ;;  %v939_v40 = vpop.xlane.xlu0 %938  ;;  %v973_v42 = vmul.f32 %v1393_v20, %v2047_v18 }
 0x3ee   : > { %1400 = vrcp.f32 %v939_v40  ;;  %1268 = vmatmul.mubr.bf16.vlgmr.msra.gmra.mrb[32].mxu0 %v985_v25 }
 0x3ef   : > { %v986_v37 = vpack.c.bf16 %v973_v42, %v972_v36  ;;  %1402 = vrcp.f32 %v933_v23 }
 0x3f0   : > { %v945_v54 = vpop.xlane.xlu1 %944 }
 0x3f1   : > { %v935_v9 = vpop.xlane.xlu0 %934  ;;  %1271 = vmatprep.mubr.bf16.mxu0 %v986_v37 }
 0x3f2   : > { %1404 = vrcp.f32 %v935_v9 }
 0x3f3   : > { %1406 = vrcp.f32 %v945_v54 }
 0x3f4   : > { %v1395_v55 = vpop.eup %1394  ;;  %v949_v58 = vpop.xlane.xlu1 %948 }
 0x3f5   : > { %v947_v60 = vpop.xlane.xlu0 %946  ;;  %v1397_v10 = vpop.eup %1396  ;;  %v979_v14 = vmul.f32 %v1395_v55, %v2059_v34 }
 0x3f6   : > { %1408 = vrcp.f32 %v947_v60  ;;  %v1399_v11 = vpop.eup %1398  ;;  %v976_v16 = vmul.f32 %v1397_v10, %v2057_v33 }
 0x3f7   : > { %1410 = vrcp.f32 %v949_v58  ;;  %v978_v18 = vmul.f32 %v1399_v11, %v2053_v28 }
 0x3f8   : > { %v1401_v13 = vpop.eup %1400 }
 0x3f9   : > { %v951_v15 = vpop.xlane.xlu0 %950  ;;  %v977_v12 = vmul.f32 %v1401_v13, %v2066_v43  ;;  %v1403_v17 = vpop.eup %1402  ;;  %v989_v22 = vpack.c.bf16 %v979_v14, %v978_v18 }
 0x3fa   : > { %1412 = vrcp.f32 %v951_v15  ;;  %v974_v24 = vmul.f32 %v1403_v17, %v2064_v41 }
 0x3fb   : > { %v988_v7 = vpack.c.bf16 %v977_v12, %v976_v16 }
 0x3fc   : > { %v1405_v21 = vpop.eup %1404 }
 0x3fd   : > { %1275 = vmatprep.mubr.bf16.mxu1 %v988_v7  ;;  %v975_v26 = vmul.f32 %v1405_v21, %v2072_v46  ;;  %v1407_v27 = vpop.eup %1406 }
 0x3fe   : > { %1276 = vmatmul.mubr.bf16.vlgmr.msra.gmra.mrb[48].mxu1 %v989_v22  ;;  %v980_v31 = vmul.f32 %v1407_v27, %v2070_v45 }
 0x3ff   : > { %v987_v29 = vpack.c.bf16 %v975_v26, %v974_v24 }
 0x400   : > { %v1409_v30 = vpop.eup %1408 }
 0x401   : > { %1272 = vmatmul.mubr.bf16.gmra.mrb[36].mxu0 %v987_v29  ;;  %v981_v32 = vmul.f32 %v1409_v30, %v2078_v48  ;;  %v1411_v28 = vpop.eup %1410 }
 0x402   : > { %v982_v35 = vmul.f32 %v1411_v28, %v2076_v47 }
 0x403   : > { %v990_v33 = vpack.c.bf16 %v981_v32, %v980_v31 }
 0x404   : > { %v1413_v34 = vpop.eup %1412 }
 0x405   : > { %1279 = vmatprep.mubr.bf16.mxu1 %v990_v33  ;;  %v983_v38 = vmul.f32 %v1413_v34, %v2082_v49 }
 0x407   : > { %v991_v39 = vpack.c.bf16 %v983_v38, %v982_v35 }
 0x409   : > { %1280 = vmatmul.mubr.bf16.gmra.mrb[52].mxu1 %v991_v39 }
 0x4c1   : > { %v1269_v41 = vpop.f32.mrb[32].mxu0 }
 0x4c2   : > { %1099 = vst.msk [vmem:[%s2105_s3 + $0x10] sm:$0xff] %vm643_vm0, %v1269_v41  ;;  %v1034_v43 = vpop.f32.mrb[33].mxu0 }
 0x4c3   : > { %1097 = vst.msk [vmem:[%s2105_s3] sm:$0xff] %vm643_vm0, %v1034_v43  ;;  %v1270_v44 = vpop.f32.mrb[34].mxu0 }
 0x4c4   : > { %1100 = vst.msk [vmem:[%s2105_s3 + $0x18] sm:$0xff] %vm643_vm0, %v1270_v44  ;;  %v1037_v45 = vpop.f32.mrb[35].mxu0 }
 0x4c5   : > { %1098 = vst.msk [vmem:[%s2105_s3 + $0x8] sm:$0xff] %vm643_vm0, %v1037_v45 }
 0x4d1   : > { %v1277_v46 = vpop.f32.mrb[48].mxu1 }
 0x4d2   : > { %1107 = vst.msk [vmem:[%s2105_s3 + $0x50] sm:$0xff] %vm643_vm0, %v1277_v46  ;;  %v1066_v47 = vpop.f32.mrb[49].mxu1 }
 0x4d3   : > { %1105 = vst.msk [vmem:[%s2105_s3 + $0x40] sm:$0xff] %vm643_vm0, %v1066_v47  ;;  %v1278_v48 = vpop.f32.mrb[50].mxu1 }
 0x4d4   : > { %1108 = vst.msk [vmem:[%s2105_s3 + $0x58] sm:$0xff] %vm643_vm0, %v1278_v48  ;;  %v1273_v49 = vpop.f32.mrb[36].mxu0  ;;  %v1069_v50 = vpop.f32.mrb[51].mxu1 }
 0x4d5   : > { %1103 = vst.msk [vmem:[%s2105_s3 + $0x30] sm:$0xff] %vm643_vm0, %v1273_v49  ;;  %1106 = vst.msk [vmem:[%s2105_s3 + $0x48] sm:$0xff] %vm643_vm0, %v1069_v50  ;;  %v1050_v51 = vpop.f32.mrb[37].mxu0 }
 0x4d6   : > { %1101 = vst.msk [vmem:[%s2105_s3 + $0x20] sm:$0xff] %vm643_vm0, %v1050_v51  ;;  %v1274_v52 = vpop.f32.mrb[38].mxu0 }
 0x4d7   : > { %1104 = vst.msk [vmem:[%s2105_s3 + $0x38] sm:$0xff] %vm643_vm0, %v1274_v52  ;;  %v1053_v56 = vpop.f32.mrb[39].mxu0 }
 0x4d8   : > { %1102 = vst.msk [vmem:[%s2105_s3 + $0x28] sm:$0xff] %vm643_vm0, %v1053_v56 }
 0x4dc   : > { %v1281_v57 = vpop.f32.mrb[52].mxu1 }
 0x4dd   : > { %1111 = vst.msk [vmem:[%s2105_s3 + $0x70] sm:$0xff] %vm643_vm0, %v1281_v57  ;;  %v1082_v59 = vpop.f32.mrb[53].mxu1 }
 0x4de   : > { %1109 = vst.msk [vmem:[%s2105_s3 + $0x60] sm:$0xff] %vm643_vm0, %v1082_v59  ;;  %v1282_v61 = vpop.f32.mrb[54].mxu1 }
 0x4df   : > { %1112 = vst.msk [vmem:[%s2105_s3 + $0x78] sm:$0xff] %vm643_vm0, %v1282_v61  ;;  %v1085_v62 = vpop.f32.mrb[55].mxu1 }
 0x4e0   : > { %1110 = vst.msk [vmem:[%s2105_s3 + $0x68] sm:$0xff] %vm643_vm0, %v1085_v62 }
 0x4e1 PF: > { %s12_s9 = sadd.s32 1, %s1420_s9  }
 0x4e2   : > { %p9_p4 = scmp.ge.s32.totalorder %s12_s9, 4  }
 0x4e4   :  { %11 = sbr.rel (!%p9_p4) target bundleno = 1 (0x1), region = 58 }

</bundles_post_ra>
